<compile_context>
chip_gen: v6e
topology: v6e:2x2x1
jax: 0.10.0
libtpu: 0.0.40
codegen_flags: <defaults>
</compile_context>

<pallas_src>
import jax
import jax.numpy as jnp
from jax.experimental import pallas as pl
from jax.experimental.pallas import tpu as pltpu

BN_EPS = 1e-5
_TARGET_TILE = 32 * 1024  # target spatial (lane) tile size


def _conv1x1(w, x):
    """(Cout, Cin) @ (Cin, TS) -> (Cout, TS) in f32.

    For tiny channel counts do the contraction as Cin broadcast FMAs on the
    VPU; fall back to the MXU for large channel counts.
    """
    cin = x.shape[0]
    if cin <= 16:
        y = w[:, 0:1] * x[0:1, :]
        for k in range(1, cin):
            y = y + w[:, k:k + 1] * x[k:k + 1, :]
        return y
    return jnp.dot(w, x, preferred_element_type=jnp.float32)


def _stats_kernel(x_ref, w_ref, sum_ref, sq_ref):
    @pl.when(jnp.logical_and(pl.program_id(0) == 0, pl.program_id(1) == 0))
    def _init():
        sum_ref[...] = jnp.zeros_like(sum_ref)
        sq_ref[...] = jnp.zeros_like(sq_ref)

    x = x_ref[0].astype(jnp.float32)        # (Cin, TS)
    w = w_ref[...].astype(jnp.float32)      # (Cout, Cin)
    y = _conv1x1(w, x)                      # (Cout, TS) f32
    sum_ref[...] += jnp.sum(y, axis=1, keepdims=True)       # (Cout, 1)
    sq_ref[...] += jnp.sum(y * y, axis=1, keepdims=True)    # (Cout, 1)


def _apply_kernel(x_ref, w_ref, scale_ref, shift_ref, o_ref):
    x = x_ref[0].astype(jnp.float32)        # (Cin, TS)
    w = w_ref[...].astype(jnp.float32)      # (Cout, Cin)
    y = _conv1x1(w, x)                      # (Cout, TS) f32
    y = y * scale_ref[...] + shift_ref[...]           # fused BN scale/shift
    o_ref[0] = jnp.maximum(y, 0.0).astype(o_ref.dtype)


def _pick_tile(s, target=_TARGET_TILE):
    """Largest lane-aligned divisor of s not exceeding `target` (else full s)."""
    if s <= target:
        return s
    start = (target // 128) * 128
    for ts in range(start, 127, -128):
        if s % ts == 0:
            return ts
    return s  # no lane-aligned divisor: single full-extent block is still legal


def _compiler_params(semantics, ts, cin, cout):
    # double-buffered f32 x/out tiles + headroom for in-kernel temporaries
    tile_bytes = (cin + cout) * ts * 4
    limit = int(min(32 * 1024 * 1024, max(16 * 1024 * 1024, 8 * tile_bytes)))
    return pltpu.CompilerParams(dimension_semantics=semantics,
                                vmem_limit_bytes=limit)


@jax.jit
def unet_grid_gating_signal3(x_ncdhw, weight, bias, gamma, beta):
    """x: (N, Cin, D, H, W); weight: (Cout, Cin, 1, 1, 1); bias/gamma/beta: (Cout,)."""
    del bias  # cancels exactly against the BatchNorm batch-mean subtraction
    n, cin, d, h, w = x_ncdhw.shape
    cout = weight.shape[0]
    s = d * h * w
    ts = _pick_tile(s)
    n_s_tiles = s // ts

    x3 = x_ncdhw.reshape(n, cin, s)                      # free view, no transpose
    w2 = weight.reshape(cout, cin).astype(jnp.float32)   # (Cout, Cin)

    x_spec = pl.BlockSpec((1, cin, ts), lambda i, j: (i, 0, j))
    w_spec = pl.BlockSpec((cout, cin), lambda i, j: (0, 0))
    vec_spec = pl.BlockSpec((cout, 1), lambda i, j: (0, 0))

    # ---- pass 1: per-channel sum / sum-of-squares of y = W @ x -------------
    ch_sum, ch_sq = pl.pallas_call(
        _stats_kernel,
        out_shape=(jax.ShapeDtypeStruct((cout, 1), jnp.float32),
                   jax.ShapeDtypeStruct((cout, 1), jnp.float32)),
        grid=(n, n_s_tiles),
        in_specs=[x_spec, w_spec],
        out_specs=(vec_spec, vec_spec),
        compiler_params=_compiler_params(("arbitrary", "arbitrary"), ts, cin, cout),
    )(x3, w2)

    # ---- fold BN into per-channel scale / shift (tiny, plain JAX) ----------
    count = jnp.float32(n * s)
    mean = ch_sum / count
    var = jnp.maximum(ch_sq / count - mean * mean, 0.0)
    scale = gamma.astype(jnp.float32).reshape(cout, 1) * jax.lax.rsqrt(var + BN_EPS)
    shift = beta.astype(jnp.float32).reshape(cout, 1) - scale * mean

    # ---- pass 2: y*scale + shift, ReLU, lane-dense streaming store ---------
    out3 = pl.pallas_call(
        _apply_kernel,
        out_shape=jax.ShapeDtypeStruct((n, cout, s), x_ncdhw.dtype),
        grid=(n, n_s_tiles),
        in_specs=[x_spec, w_spec, vec_spec, vec_spec],
        out_specs=pl.BlockSpec((1, cout, ts), lambda i, j: (i, 0, j)),
        compiler_params=_compiler_params(("parallel", "parallel"), ts, cin, cout),
    )(x3, w2, scale, shift)

    return out3.reshape(n, cout, d, h, w)


def init_params(key, in_size, out_size):
    """PyTorch-like defaults: Conv3d kaiming-uniform-ish, BN gamma=1 / beta=0."""
    k_w, k_b = jax.random.split(key)
    bound = 1.0 / jnp.sqrt(in_size)
    weight = jax.random.uniform(
        k_w, (out_size, in_size, 1, 1, 1), jnp.float32, -bound, bound)
    bias = jax.random.uniform(k_b, (out_size,), jnp.float32, -bound, bound)
    gamma = jnp.ones((out_size,), jnp.float32)
    beta = jnp.zeros((out_size,), jnp.float32)
    return weight, bias, gamma, beta


if __name__ == "__main__":
    key = jax.random.PRNGKey(0)
    k_x, k_p = jax.random.split(key)

    # Small shapes consistent with the module: N=2, Cin=4, Cout=8, D=H=W=8
    N, CIN, COUT, D, H, W = 2, 4, 8, 8, 8, 8
    x = jax.random.normal(k_x, (N, CIN, D, H, W), jnp.float32)
    weight, bias, gamma, beta = init_params(k_p, CIN, COUT)

    out = unet_grid_gating_signal3(x, weight, bias, gamma, beta)
    out = jax.block_until_ready(out)

    # Pure-JAX reference (true module math, including the conv bias that the
    # kernel omits because BatchNorm cancels it exactly).
    x2d = jnp.transpose(x, (0, 2, 3, 4, 1)).reshape(-1, CIN)
    y = x2d @ weight.reshape(COUT, CIN).T + bias
    mean = jnp.mean(y, axis=0, keepdims=True)
    var = jnp.mean((y - mean) ** 2, axis=0, keepdims=True)
    y = gamma * (y - mean) / jnp.sqrt(var + BN_EPS) + beta
    ref = jnp.maximum(y, 0.0).reshape(N, D, H, W, COUT).transpose(0, 4, 1, 2, 3)

    assert out.shape == (N, COUT, D, H, W)
    assert jnp.allclose(out, ref, atol=1e-3, rtol=1e-3), \
        float(jnp.max(jnp.abs(out - ref)))
    print("KERNEL_OK")
</pallas_src>

<mosaic_0001>
module attributes {stable_mosaic.version = 11 : i64} {
  func.func @_stats_kernel(%arg0: i32, %arg1: i32, %arg2: memref<1x4x512xf32, #tpu.memory_space<vmem>>, %arg3: memref<8x4xf32, #tpu.memory_space<vmem>>, %arg4: memref<8x1xf32, #tpu.memory_space<vmem>>, %arg5: memref<8x1xf32, #tpu.memory_space<vmem>>) attributes {dimension_semantics = [#tpu.dimension_semantics<arbitrary>, #tpu.dimension_semantics<arbitrary>], iteration_bounds = array<i64: 2, 1>, scalar_prefetch = 0 : i64, scratch_operands = 0 : i64, tpu.core_type = #tpu.core_type<tc>, window_params = [{transform_indices = @transform_0, window_bounds = array<i64: 1, 4, 512>}, {pipeline_mode = #tpu.pipeline_mode<synchronous>, transform_indices = @transform_1, window_bounds = array<i64: 8, 4>}, {pipeline_mode = #tpu.pipeline_mode<synchronous>, transform_indices = @transform_2, window_bounds = array<i64: 8, 1>}, {pipeline_mode = #tpu.pipeline_mode<synchronous>, transform_indices = @transform_3, window_bounds = array<i64: 8, 1>}]} {
    %c0_i32 = arith.constant 0 : i32
    %0 = arith.cmpi eq, %arg0, %c0_i32 : i32
    %c0_i32_0 = arith.constant 0 : i32
    %1 = arith.cmpi eq, %arg1, %c0_i32_0 : i32
    %2 = arith.andi %0, %1 : i1
    %3 = arith.extui %2 : i1 to i32
    %c0_i32_1 = arith.constant 0 : i32
    %4 = arith.cmpi ne, %3, %c0_i32_1 : i32
    scf.if %4 {
      %cst_15 = arith.constant 0.000000e+00 : f32
      %42 = vector.broadcast %cst_15 : f32 to vector<8x1xf32>
      %c0_16 = arith.constant 0 : index
      %c0_17 = arith.constant 0 : index
      %43 = vector.load %arg4[%c0_16, %c0_17] : memref<8x1xf32, #tpu.memory_space<vmem>>, vector<8x1xf32>
      tpu.vector_store %arg4[%c0_16, %c0_17], %42 {strides = array<i32>} : memref<8x1xf32, #tpu.memory_space<vmem>>, vector<8x1xf32>,
      %cst_18 = arith.constant 0.000000e+00 : f32
      %44 = vector.broadcast %cst_18 : f32 to vector<8x1xf32>
      %c0_19 = arith.constant 0 : index
      %c0_20 = arith.constant 0 : index
      %45 = vector.load %arg5[%c0_19, %c0_20] : memref<8x1xf32, #tpu.memory_space<vmem>>, vector<8x1xf32>
      tpu.vector_store %arg5[%c0_19, %c0_20], %44 {strides = array<i32>} : memref<8x1xf32, #tpu.memory_space<vmem>>, vector<8x1xf32>,
    } else {
    }
    %c0 = arith.constant 0 : index
    %c0_2 = arith.constant 0 : index
    %c0_3 = arith.constant 0 : index
    %5 = vector.load %arg2[%c0, %c0_2, %c0_3] : memref<1x4x512xf32, #tpu.memory_space<vmem>>, vector<1x4x512xf32>
    %6 = vector.shape_cast %5 : vector<1x4x512xf32> to vector<4x512xf32>
    %c0_4 = arith.constant 0 : index
    %c0_5 = arith.constant 0 : index
    %7 = vector.load %arg3[%c0_4, %c0_5] : memref<8x4xf32, #tpu.memory_space<vmem>>, vector<8x4xf32>
    %8 = vector.extract_strided_slice %7 {offsets = [0, 0], sizes = [8, 1], strides = [1, 1]} : vector<8x4xf32> to vector<8x1xf32>
    %9 = vector.extract_strided_slice %6 {offsets = [0, 0], sizes = [1, 512], strides = [1, 1]} : vector<4x512xf32> to vector<1x512xf32>
    %10 = vector.broadcast %8 : vector<8x1xf32> to vector<8x512xf32>
    %11 = vector.broadcast %9 : vector<1x512xf32> to vector<8x512xf32>
    %12 = arith.mulf %10, %11 : vector<8x512xf32>
    %13 = vector.extract_strided_slice %7 {offsets = [0, 1], sizes = [8, 1], strides = [1, 1]} : vector<8x4xf32> to vector<8x1xf32>
    %14 = vector.extract_strided_slice %6 {offsets = [1, 0], sizes = [1, 512], strides = [1, 1]} : vector<4x512xf32> to vector<1x512xf32>
    %15 = vector.broadcast %13 : vector<8x1xf32> to vector<8x512xf32>
    %16 = vector.broadcast %14 : vector<1x512xf32> to vector<8x512xf32>
    %17 = arith.mulf %15, %16 : vector<8x512xf32>
    %18 = arith.addf %12, %17 : vector<8x512xf32>
    %19 = vector.extract_strided_slice %7 {offsets = [0, 2], sizes = [8, 1], strides = [1, 1]} : vector<8x4xf32> to vector<8x1xf32>
    %20 = vector.extract_strided_slice %6 {offsets = [2, 0], sizes = [1, 512], strides = [1, 1]} : vector<4x512xf32> to vector<1x512xf32>
    %21 = vector.broadcast %19 : vector<8x1xf32> to vector<8x512xf32>
    %22 = vector.broadcast %20 : vector<1x512xf32> to vector<8x512xf32>
    %23 = arith.mulf %21, %22 : vector<8x512xf32>
    %24 = arith.addf %18, %23 : vector<8x512xf32>
    %25 = vector.extract_strided_slice %7 {offsets = [0, 3], sizes = [8, 1], strides = [1, 1]} : vector<8x4xf32> to vector<8x1xf32>
    %26 = vector.extract_strided_slice %6 {offsets = [3, 0], sizes = [1, 512], strides = [1, 1]} : vector<4x512xf32> to vector<1x512xf32>
    %27 = vector.broadcast %25 : vector<8x1xf32> to vector<8x512xf32>
    %28 = vector.broadcast %26 : vector<1x512xf32> to vector<8x512xf32>
    %29 = arith.mulf %27, %28 : vector<8x512xf32>
    %30 = arith.addf %24, %29 : vector<8x512xf32>
    %c0_6 = arith.constant 0 : index
    %c0_7 = arith.constant 0 : index
    %31 = vector.load %arg4[%c0_6, %c0_7] : memref<8x1xf32, #tpu.memory_space<vmem>>, vector<8x1xf32>
    %cst = arith.constant dense<0.000000e+00> : vector<8xf32>
    %32 = vector.multi_reduction <add>, %30, %cst [1] : vector<8x512xf32> to vector<8xf32>
    %33 = vector.shape_cast %32 : vector<8xf32> to vector<8x1xf32>
    %34 = arith.addf %31, %33 : vector<8x1xf32>
    %c0_8 = arith.constant 0 : index
    %c0_9 = arith.constant 0 : index
    %35 = vector.load %arg4[%c0_8, %c0_9] : memref<8x1xf32, #tpu.memory_space<vmem>>, vector<8x1xf32>
    tpu.vector_store %arg4[%c0_8, %c0_9], %34 {strides = array<i32>} : memref<8x1xf32, #tpu.memory_space<vmem>>, vector<8x1xf32>,
    %c0_10 = arith.constant 0 : index
    %c0_11 = arith.constant 0 : index
    %36 = vector.load %arg5[%c0_10, %c0_11] : memref<8x1xf32, #tpu.memory_space<vmem>>, vector<8x1xf32>
    %37 = arith.mulf %30, %30 : vector<8x512xf32>
    %cst_12 = arith.constant dense<0.000000e+00> : vector<8xf32>
    %38 = vector.multi_reduction <add>, %37, %cst_12 [1] : vector<8x512xf32> to vector<8xf32>
    %39 = vector.shape_cast %38 : vector<8xf32> to vector<8x1xf32>
    %40 = arith.addf %36, %39 : vector<8x1xf32>
    %c0_13 = arith.constant 0 : index
    %c0_14 = arith.constant 0 : index
    %41 = vector.load %arg5[%c0_13, %c0_14] : memref<8x1xf32, #tpu.memory_space<vmem>>, vector<8x1xf32>
    tpu.vector_store %arg5[%c0_13, %c0_14], %40 {strides = array<i32>} : memref<8x1xf32, #tpu.memory_space<vmem>>, vector<8x1xf32>,
    return
  }
  func.func @transform_0(%arg0: i32, %arg1: i32) -> (i32, i32, i32) {
    %c0_i32 = arith.constant 0 : i32
    %c0_i32_0 = arith.constant 0 : i32
    return %arg0, %c0_i32, %arg1 : i32, i32, i32
  }
  func.func @transform_1(%arg0: i32, %arg1: i32) -> (i32, i32) {
    %c0_i32 = arith.constant 0 : i32
    %c0_i32_0 = arith.constant 0 : i32
    %c0_i32_1 = arith.constant 0 : i32
    return %c0_i32, %c0_i32_0 : i32, i32
  }
  func.func @transform_2(%arg0: i32, %arg1: i32) -> (i32, i32) {
    %c0_i32 = arith.constant 0 : i32
    %c0_i32_0 = arith.constant 0 : i32
    %c0_i32_1 = arith.constant 0 : i32
    return %c0_i32, %c0_i32_0 : i32, i32
  }
  func.func @transform_3(%arg0: i32, %arg1: i32) -> (i32, i32) {
    %c0_i32 = arith.constant 0 : i32
    %c0_i32_0 = arith.constant 0 : i32
    %c0_i32_1 = arith.constant 0 : i32
    return %c0_i32, %c0_i32_0 : i32, i32
  }
}

module attributes {stable_mosaic.version = 11 : i64} {
  func.func @_apply_kernel(%arg0: i32, %arg1: i32, %arg2: memref<1x4x512xf32, #tpu.memory_space<vmem>>, %arg3: memref<8x4xf32, #tpu.memory_space<vmem>>, %arg4: memref<8x1xf32, #tpu.memory_space<vmem>>, %arg5: memref<8x1xf32, #tpu.memory_space<vmem>>, %arg6: memref<1x8x512xf32, #tpu.memory_space<vmem>>) attributes {dimension_semantics = [#tpu.dimension_semantics<parallel>, #tpu.dimension_semantics<parallel>], iteration_bounds = array<i64: 2, 1>, scalar_prefetch = 0 : i64, scratch_operands = 0 : i64, tpu.core_type = #tpu.core_type<tc>, window_params = [{transform_indices = @transform_0, window_bounds = array<i64: 1, 4, 512>}, {pipeline_mode = #tpu.pipeline_mode<synchronous>, transform_indices = @transform_1, window_bounds = array<i64: 8, 4>}, {pipeline_mode = #tpu.pipeline_mode<synchronous>, transform_indices = @transform_2, window_bounds = array<i64: 8, 1>}, {pipeline_mode = #tpu.pipeline_mode<synchronous>, transform_indices = @transform_3, window_bounds = array<i64: 8, 1>}, {transform_indices = @transform_4, window_bounds = array<i64: 1, 8, 512>}]} {
    %c0 = arith.constant 0 : index
    %c0_0 = arith.constant 0 : index
    %c0_1 = arith.constant 0 : index
    %0 = vector.load %arg2[%c0, %c0_0, %c0_1] : memref<1x4x512xf32, #tpu.memory_space<vmem>>, vector<1x4x512xf32>
    %1 = vector.shape_cast %0 : vector<1x4x512xf32> to vector<4x512xf32>
    %c0_2 = arith.constant 0 : index
    %c0_3 = arith.constant 0 : index
    %2 = vector.load %arg3[%c0_2, %c0_3] : memref<8x4xf32, #tpu.memory_space<vmem>>, vector<8x4xf32>
    %3 = vector.extract_strided_slice %2 {offsets = [0, 0], sizes = [8, 1], strides = [1, 1]} : vector<8x4xf32> to vector<8x1xf32>
    %4 = vector.extract_strided_slice %1 {offsets = [0, 0], sizes = [1, 512], strides = [1, 1]} : vector<4x512xf32> to vector<1x512xf32>
    %5 = vector.broadcast %3 : vector<8x1xf32> to vector<8x512xf32>
    %6 = vector.broadcast %4 : vector<1x512xf32> to vector<8x512xf32>
    %7 = arith.mulf %5, %6 : vector<8x512xf32>
    %8 = vector.extract_strided_slice %2 {offsets = [0, 1], sizes = [8, 1], strides = [1, 1]} : vector<8x4xf32> to vector<8x1xf32>
    %9 = vector.extract_strided_slice %1 {offsets = [1, 0], sizes = [1, 512], strides = [1, 1]} : vector<4x512xf32> to vector<1x512xf32>
    %10 = vector.broadcast %8 : vector<8x1xf32> to vector<8x512xf32>
    %11 = vector.broadcast %9 : vector<1x512xf32> to vector<8x512xf32>
    %12 = arith.mulf %10, %11 : vector<8x512xf32>
    %13 = arith.addf %7, %12 : vector<8x512xf32>
    %14 = vector.extract_strided_slice %2 {offsets = [0, 2], sizes = [8, 1], strides = [1, 1]} : vector<8x4xf32> to vector<8x1xf32>
    %15 = vector.extract_strided_slice %1 {offsets = [2, 0], sizes = [1, 512], strides = [1, 1]} : vector<4x512xf32> to vector<1x512xf32>
    %16 = vector.broadcast %14 : vector<8x1xf32> to vector<8x512xf32>
    %17 = vector.broadcast %15 : vector<1x512xf32> to vector<8x512xf32>
    %18 = arith.mulf %16, %17 : vector<8x512xf32>
    %19 = arith.addf %13, %18 : vector<8x512xf32>
    %20 = vector.extract_strided_slice %2 {offsets = [0, 3], sizes = [8, 1], strides = [1, 1]} : vector<8x4xf32> to vector<8x1xf32>
    %21 = vector.extract_strided_slice %1 {offsets = [3, 0], sizes = [1, 512], strides = [1, 1]} : vector<4x512xf32> to vector<1x512xf32>
    %22 = vector.broadcast %20 : vector<8x1xf32> to vector<8x512xf32>
    %23 = vector.broadcast %21 : vector<1x512xf32> to vector<8x512xf32>
    %24 = arith.mulf %22, %23 : vector<8x512xf32>
    %25 = arith.addf %19, %24 : vector<8x512xf32>
    %c0_4 = arith.constant 0 : index
    %c0_5 = arith.constant 0 : index
    %26 = vector.load %arg4[%c0_4, %c0_5] : memref<8x1xf32, #tpu.memory_space<vmem>>, vector<8x1xf32>
    %27 = vector.broadcast %26 : vector<8x1xf32> to vector<8x512xf32>
    %28 = arith.mulf %25, %27 : vector<8x512xf32>
    %c0_6 = arith.constant 0 : index
    %c0_7 = arith.constant 0 : index
    %29 = vector.load %arg5[%c0_6, %c0_7] : memref<8x1xf32, #tpu.memory_space<vmem>>, vector<8x1xf32>
    %30 = vector.broadcast %29 : vector<8x1xf32> to vector<8x512xf32>
    %31 = arith.addf %28, %30 : vector<8x512xf32>
    %cst = arith.constant 0.000000e+00 : f32
    %32 = vector.broadcast %cst : f32 to vector<8x512xf32>
    %33 = arith.maximumf %31, %32 : vector<8x512xf32>
    %c0_8 = arith.constant 0 : index
    %c0_9 = arith.constant 0 : index
    %c0_10 = arith.constant 0 : index
    %34 = vector.load %arg6[%c0_8, %c0_9, %c0_10] : memref<1x8x512xf32, #tpu.memory_space<vmem>>, vector<1x8x512xf32>
    %35 = vector.shape_cast %34 : vector<1x8x512xf32> to vector<8x512xf32>
    %36 = vector.shape_cast %33 : vector<8x512xf32> to vector<1x8x512xf32>
    tpu.vector_store %arg6[%c0_8, %c0_9, %c0_10], %36 {strides = array<i32>} : memref<1x8x512xf32, #tpu.memory_space<vmem>>, vector<1x8x512xf32>,
    return
  }
  func.func @transform_0(%arg0: i32, %arg1: i32) -> (i32, i32, i32) {
    %c0_i32 = arith.constant 0 : i32
    %c0_i32_0 = arith.constant 0 : i32
    return %arg0, %c0_i32, %arg1 : i32, i32, i32
  }
  func.func @transform_1(%arg0: i32, %arg1: i32) -> (i32, i32) {
    %c0_i32 = arith.constant 0 : i32
    %c0_i32_0 = arith.constant 0 : i32
    %c0_i32_1 = arith.constant 0 : i32
    return %c0_i32, %c0_i32_0 : i32, i32
  }
  func.func @transform_2(%arg0: i32, %arg1: i32) -> (i32, i32) {
    %c0_i32 = arith.constant 0 : i32
    %c0_i32_0 = arith.constant 0 : i32
    %c0_i32_1 = arith.constant 0 : i32
    return %c0_i32, %c0_i32_0 : i32, i32
  }
  func.func @transform_3(%arg0: i32, %arg1: i32) -> (i32, i32) {
    %c0_i32 = arith.constant 0 : i32
    %c0_i32_0 = arith.constant 0 : i32
    %c0_i32_1 = arith.constant 0 : i32
    return %c0_i32, %c0_i32_0 : i32, i32
  }
  func.func @transform_4(%arg0: i32, %arg1: i32) -> (i32, i32, i32) {
    %c0_i32 = arith.constant 0 : i32
    %c0_i32_0 = arith.constant 0 : i32
    return %arg0, %c0_i32, %arg1 : i32, i32, i32
  }
}

</mosaic_0001>

<bundles_post_ra>
// kernel: unet_grid_gating_signal3.3
= control target key start
LH: loop header
LB: loop body
LE: loop exit
PB: predicated region body
PF: predicated region fallthrough
CT: control target
= control target key end

     0   :  { %s646_s15 = smov 0   ;;  %s648_s16 = smov 0   ;;  %s696_s0 = inlined_call_operand.vmem [shape: f32[2,4,512], index: 0, kind: input, shape index: {}]   ;;  %s697_s1 = inlined_call_operand.vmem [shape: f32[8,4], index: 1, kind: input, shape index: {}]   ;;  %s698_s2 = inlined_call_operand.vmem [shape: f32[8,1], index: 2, kind: input, shape index: {}]   ;;  %s699_s3 = inlined_call_operand.vmem [shape: f32[8,1], index: 3, kind: input, shape index: {}]   ;;  %s700_s4 = inlined_call_operand.vmem [shape: f32[2,8,512], index: 4, kind: output, shape index: {}]  }
   0x1   :  { %s650_s17 = smov 0  }
   0x2 LB: > { %s26_s18 = sadd.s32 1, %s611_s16  ;;  %p550_p0 = scmp.ge.s32.totalorder %s615_s17, 1  ;;  %s615_s17 = sphi %s650_s17, %s14_s17   ;;  %s611_s16 = sphi %s648_s16, %s702_s16   ;;  %s607_s15 = sphi %s646_s15, %s701_s15  }
   0x3   : > { %p28_p1 = scmp.ge.s32.totalorder %s26_s18, 2  ;;  %p183_p2 = scmp.lt.s32.totalorder %s615_s17, 3 }
   0x5   : > { %s704_s18 = smov (%p28_p1, %s26_s18), 0  ;;  %p184_p3 = pnand %p550_p0, %p183_p2 }
   0x6   : > { %p218_p4 = scmp.lt.s32.totalorder (!%p184_p3), %s607_s15, 1 }
   0x7   : > { %187 = sbr.rel (%p184_p3) target bundleno = 159 (0x9f), region = 36 }
   0xc   : > { %v239_v0 = vld [vmem:[%s697_s1] sm:$0xff]  ;;  %v617_v1 = vmov 0   ;;  %v618_v2 = vmov 2   ;;  %v619_v3 = vmov 1   ;;  %v620_v4 = vmov 3   ;;  %s706_s15 = smov (!%p218_p4, %s607_s15), 1 }
   0xd   : > { %587 = vset.pattern.permute.xlu0 %v617_v1  ;;  %589 = vset.pattern.permute.xlu1 %v618_v2  ;;  %v431_v5 = vld [vmem:[%s698_s2] sm:$0xff]  ;;  %v247_v7 = vlaneseq  ;;  %s557_s25 = sshll.u32 %s706_s15, 4  ;;  %s558_s29 = sshll.u32 %s706_s15, 5 }
   0xe   : > { %242 = vperm.xlu0 %587, %v239_v0   ;;  %336 = vperm.xlu1 %589, %v239_v0   ;;  %v441_v6 = vld [vmem:[%s699_s3] sm:$0xff]  ;;  %s225_s28 = scalar_lea.vmem %s696_s0, %s557_s25  ;;  %s235_s6 = scalar_lea.vmem %s700_s4, %s558_s29 }
   0xf   : > { %v248_v8 = vshrl.u32 %v247_v7, 7  ;;  %v237_v11 = vld [vmem:[%s225_s28] sm:$0xff]  ;;  %v238_v12 = vld [vmem:[%s225_s28 + $0x8] sm:$0xff] }
  0x11   : > { %v249_v9 = vsub.s32 0, %v248_v8  ;;  %v253_v10 = vsub.s32 4, %v248_v8  ;;  %v341_v13 = vsub.s32 2, %v248_v8  ;;  %v345_v14 = vsub.s32 6, %v248_v8 }
  0x12   : > { %588 = vset.pattern.permute.xlu0 %v619_v3  ;;  %590 = vset.pattern.permute.xlu1 %v620_v4  ;;  %v293_v15 = vsub.s32 1, %v248_v8  ;;  %v297_v16 = vsub.s32 5, %v248_v8  ;;  %v389_v17 = vsub.s32 3, %v248_v8  ;;  %v393_v18 = vsub.s32 7, %v248_v8 }
  0x13   : > { %288 = vperm.xlu0 %588, %v239_v0   ;;  %384 = vperm.xlu1 %590, %v239_v0   ;;  %v250_v19 = vrot.slane %v237_v11, %v249_v9  ;;  %v254_v20 = vrot.slane %v237_v11, %v253_v10  ;;  %v258_v21 = vrot.slane %v238_v12, %v249_v9 }
  0x14   : > { %v262_v22 = vrot.slane %v238_v12, %v253_v10  ;;  %v342_v23 = vrot.slane %v237_v11, %v341_v13  ;;  %v346_v24 = vrot.slane %v237_v11, %v345_v14  ;;  %v350_v25 = vrot.slane %v238_v12, %v341_v13 }
  0x15   : > { %v354_v26 = vrot.slane %v238_v12, %v345_v14  ;;  %v294_v27 = vrot.slane %v237_v11, %v293_v15  ;;  %v298_v28 = vrot.slane %v237_v11, %v297_v16  ;;  %v302_v29 = vrot.slane %v238_v12, %v293_v15 }
  0x16   : > { %v306_v30 = vrot.slane %v238_v12, %v297_v16  ;;  %v390_v31 = vrot.slane %v237_v11, %v389_v17  ;;  %v394_v32 = vrot.slane %v237_v11, %v393_v18  ;;  %v398_v33 = vrot.slane %v238_v12, %v389_v17 }
  0x17   : > { %591 = vset.pattern.permute.xlu1 %v617_v1  ;;  %592 = vset.pattern.permute.xlu0 %v617_v1  ;;  %v402_v34 = vrot.slane %v238_v12, %v393_v18  ;;  %v270_v36 = vrot.slane %v250_v19, %v249_v9  ;;  %v274_v37 = vrot.slane %v254_v20, %v249_v9 }
  0x18   : > { %434 = vperm.xlu1 %591, %v431_v5   ;;  %444 = vperm.xlu0 %592, %v441_v6   ;;  %v278_v38 = vrot.slane %v258_v21, %v249_v9  ;;  %v282_v39 = vrot.slane %v262_v22, %v249_v9  ;;  %v362_v41 = vrot.slane %v342_v23, %v341_v13 }
  0x19   : > { %v366_v42 = vrot.slane %v346_v24, %v341_v13  ;;  %v370_v43 = vrot.slane %v350_v25, %v341_v13  ;;  %v374_v44 = vrot.slane %v354_v26, %v341_v13  ;;  %v314_v45 = vrot.slane %v294_v27, %v293_v15 }
  0x1a   : > { %v318_v46 = vrot.slane %v298_v28, %v293_v15  ;;  %v322_v47 = vrot.slane %v302_v29, %v293_v15  ;;  %v326_v48 = vrot.slane %v306_v30, %v293_v15  ;;  %v410_v49 = vrot.slane %v390_v31, %v389_v17 }
  0x1b   : > { %v414_v50 = vrot.slane %v394_v32, %v389_v17  ;;  %v418_v51 = vrot.slane %v398_v33, %v389_v17  ;;  %v422_v52 = vrot.slane %v402_v34, %v389_v17 }
  0x89   : > { %v243_v35 = vpop.permute.xlu0 %242  ;;  %v337_v40 = vpop.permute.xlu1 %336 }
  0x8a   : > { %v283_v53 = vmul.f32 %v270_v36, %v243_v35  ;;  %v284_v54 = vmul.f32 %v274_v37, %v243_v35  ;;  %v285_v55 = vmul.f32 %v278_v38, %v243_v35  ;;  %v286_v56 = vmul.f32 %v282_v39, %v243_v35 }
  0x8b   : > { %v375_v57 = vmul.f32 %v362_v41, %v337_v40  ;;  %v376_v58 = vmul.f32 %v366_v42, %v337_v40  ;;  %v377_v59 = vmul.f32 %v370_v43, %v337_v40  ;;  %v378_v60 = vmul.f32 %v374_v44, %v337_v40 }
  0x8e   : > { %v289_v61 = vpop.permute.xlu0 %288  ;;  %v385_v62 = vpop.permute.xlu1 %384 }
  0x8f   : > { %v327_v63 = vmul.f32 %v314_v45, %v289_v61  ;;  %v328_v0 = vmul.f32 %v318_v46, %v289_v61  ;;  %v329_v1 = vmul.f32 %v322_v47, %v289_v61  ;;  %v330_v2 = vmul.f32 %v326_v48, %v289_v61 }
  0x90   : > { %v423_v3 = vmul.f32 %v410_v49, %v385_v62  ;;  %v424_v4 = vmul.f32 %v414_v50, %v385_v62  ;;  %v425_v5 = vmul.f32 %v418_v51, %v385_v62  ;;  %v426_v6 = vmul.f32 %v422_v52, %v385_v62 }
  0x91   : > { %v331_v7 = vadd.f32 %v327_v63, %v283_v53  ;;  %v332_v8 = vadd.f32 %v328_v0, %v284_v54  ;;  %v333_v9 = vadd.f32 %v329_v1, %v285_v55  ;;  %v334_v10 = vadd.f32 %v330_v2, %v286_v56 }
  0x93   : > { %v379_v11 = vadd.f32 %v375_v57, %v331_v7  ;;  %v380_v12 = vadd.f32 %v376_v58, %v332_v8  ;;  %v381_v13 = vadd.f32 %v377_v59, %v333_v9  ;;  %v382_v14 = vadd.f32 %v378_v60, %v334_v10  ;;  %v435_v15 = vpop.permute.xlu1 %434  ;;  %v445_v20 = vpop.permute.xlu0 %444 }
  0x95   : > { %v427_v16 = vadd.f32 %v423_v3, %v379_v11  ;;  %v428_v17 = vadd.f32 %v424_v4, %v380_v12  ;;  %v429_v18 = vadd.f32 %v425_v5, %v381_v13  ;;  %v430_v19 = vadd.f32 %v426_v6, %v382_v14 }
  0x97   : > { %v437_v21 = vmul.f32 %v435_v15, %v427_v16  ;;  %v438_v22 = vmul.f32 %v435_v15, %v428_v17  ;;  %v439_v23 = vmul.f32 %v435_v15, %v429_v18  ;;  %v440_v24 = vmul.f32 %v435_v15, %v430_v19 }
  0x99   : > { %v447_v25 = vadd.f32 %v445_v20, %v437_v21  ;;  %v448_v26 = vadd.f32 %v445_v20, %v438_v22  ;;  %v449_v27 = vadd.f32 %v445_v20, %v439_v23  ;;  %v450_v28 = vadd.f32 %v445_v20, %v440_v24 }
  0x9b   : > { %v451_v29 = vmax.f32 %v447_v25, 0.0  ;;  %v452_v30 = vmax.f32 %v448_v26, 0.0  ;;  %v453_v31 = vmax.f32 %v449_v27, 0.0  ;;  %v454_v32 = vmax.f32 %v450_v28, 0.0 }
  0x9d   : > { %455 = vst [vmem:[%s235_s6] sm:$0xff] %v451_v29  ;;  %456 = vst [vmem:[%s235_s6 + $0x8] sm:$0xff] %v452_v30 }
  0x9e   : > { %457 = vst [vmem:[%s235_s6 + $0x10] sm:$0xff] %v453_v31  ;;  %458 = vst [vmem:[%s235_s6 + $0x18] sm:$0xff] %v454_v32 }
  0x9f PF: > { %s14_s17 = sadd.s32 1, %s615_s17   ;;  %s701_s15 = smov %s611_s16 }
  0xa0   : > { %p11_p5 = scmp.ge.s32.totalorder %s14_s17, 4   ;;  %s702_s16 = smov %s704_s18 }
  0xa2   :  { %13 = sbr.rel (!%p11_p5) target bundleno = 2 (0x2), region = 66 }

// kernel: unet_grid_gating_signal3.2
= control target key start
LH: loop header
LB: loop body
LE: loop exit
PB: predicated region body
PF: predicated region fallthrough
CT: control target
= control target key end

     0   :  { %s548_s12 = smov 0   ;;  %s550_s13 = smov 0   ;;  %s599_s0 = inlined_call_operand.vmem [shape: f32[2,4,512], index: 0, kind: input, shape index: {}]   ;;  %s600_s1 = inlined_call_operand.vmem [shape: f32[8,4], index: 1, kind: input, shape index: {}]   ;;  %s601_s2 = inlined_call_operand.vmem [shape: f32[8,1], index: 2, kind: output, shape index: {0}]   ;;  %s602_s3 = inlined_call_operand.vmem [shape: f32[8,1], index: 3, kind: output, shape index: {1}]  }
   0x1   :  { %s552_s14 = smov 0  }
   0x2 LB: > { %s26_s15 = sadd.s32 1, %s517_s13  ;;  %p457_p0 = scmp.ge.s32.totalorder %s521_s14, 1  ;;  %s521_s14 = sphi %s552_s14, %s14_s14   ;;  %s517_s13 = sphi %s550_s13, %s604_s13   ;;  %s513_s12 = sphi %s548_s12, %s603_s12  }
   0x3   : > { %p28_p1 = scmp.ge.s32.totalorder %s26_s15, 2  ;;  %p149_p2 = scmp.lt.s32.totalorder %s521_s14, 3 }
   0x5   : > { %s606_s15 = smov (%p28_p1, %s26_s15), 0  ;;  %p150_p3 = pnand %p457_p0, %p149_p2 }
   0x6   : > { %p173_p4 = scmp.lt.s32.totalorder (!%p150_p3), %s513_s12, 1  ;;  %p182_p5 = scmp.eq.s32.totalorder (!%p150_p3), %s513_s12, 0 }
   0x7   : > { %153 = sbr.rel (%p150_p3) target bundleno = 305 (0x131), region = 28 }
   0xc   : > { %s608_s12 = smov (!%p173_p4, %s513_s12), 1  ;;  %187 = sbr.rel (!%p182_p5) target bundleno = 17 (0x11), region = 32  ;;  %vm188_vm0 = vcmask (%p182_p5), 7168   ;;  %v523_v0 = vmov (%p182_p5), 0.0  }
   0xd   : > { %s463_s16 = sshll.u32 %s608_s12, 4  ;;  %189 = vst.msk [vmem:[%s601_s2] sm:$0xff] (%p182_p5), %vm188_vm0, %v523_v0  ;;  %190 = vst.msk [vmem:[%s602_s3] sm:$0xff] (%p182_p5), %vm188_vm0, %v523_v0 }
   0xe   : > { %s180_s19 = scalar_lea.vmem %s599_s0, %s463_s16 }
  0x11 PF: > { %v193_v1 = vld [vmem:[%s600_s1] sm:$0xff]  ;;  %v524_v2 = vmov 0   ;;  %v525_v3 = vmov 2   ;;  %v526_v4 = vmov 1   ;;  %v527_v5 = vmov 3   ;;  %v192_v11 = vld [vmem:[%s180_s19 + $0x8] sm:$0xff] }
  0x12   : > { %494 = vset.pattern.permute.xlu0 %v524_v2  ;;  %496 = vset.pattern.permute.xlu1 %v525_v3  ;;  %v201_v6 = vlaneseq  ;;  %v191_v10 = vld [vmem:[%s180_s19] sm:$0xff]  ;;  %vm392_vm1 = vcmask 7168  }
  0x13   : > { %196 = vperm.xlu0 %494, %v193_v1   ;;  %290 = vperm.xlu1 %496, %v193_v1  }
  0x14   : > { %v202_v7 = vshrl.u32 %v201_v6, 7 }
  0x16   : > { %v203_v8 = vsub.s32 0, %v202_v7  ;;  %v207_v9 = vsub.s32 4, %v202_v7  ;;  %v295_v12 = vsub.s32 2, %v202_v7  ;;  %v299_v13 = vsub.s32 6, %v202_v7 }
  0x17   : > { %495 = vset.pattern.permute.xlu0 %v526_v4  ;;  %497 = vset.pattern.permute.xlu1 %v527_v5  ;;  %v247_v14 = vsub.s32 1, %v202_v7  ;;  %v251_v15 = vsub.s32 5, %v202_v7  ;;  %v343_v16 = vsub.s32 3, %v202_v7  ;;  %v347_v17 = vsub.s32 7, %v202_v7 }
  0x18   : > { %242 = vperm.xlu0 %495, %v193_v1   ;;  %338 = vperm.xlu1 %497, %v193_v1   ;;  %v204_v18 = vrot.slane %v191_v10, %v203_v8  ;;  %v208_v19 = vrot.slane %v191_v10, %v207_v9  ;;  %v212_v20 = vrot.slane %v192_v11, %v203_v8 }
  0x19   : > { %v216_v21 = vrot.slane %v192_v11, %v207_v9  ;;  %v296_v22 = vrot.slane %v191_v10, %v295_v12  ;;  %v300_v23 = vrot.slane %v191_v10, %v299_v13  ;;  %v304_v24 = vrot.slane %v192_v11, %v295_v12 }
  0x1a   : > { %v248_v25 = vrot.slane %v191_v10, %v247_v14  ;;  %v252_v26 = vrot.slane %v191_v10, %v251_v15  ;;  %v256_v27 = vrot.slane %v192_v11, %v247_v14  ;;  %v260_v28 = vrot.slane %v192_v11, %v251_v15 }
  0x1b   : > { %v308_v29 = vrot.slane %v192_v11, %v299_v13  ;;  %v344_v30 = vrot.slane %v191_v10, %v343_v16  ;;  %v348_v31 = vrot.slane %v191_v10, %v347_v17  ;;  %v352_v32 = vrot.slane %v192_v11, %v343_v16 }
  0x1c   : > { %498 = vset.pattern.permute.xlu0 %v527_v5  ;;  %v224_v34 = vrot.slane %v204_v18, %v203_v8  ;;  %v228_v35 = vrot.slane %v208_v19, %v203_v8  ;;  %v232_v36 = vrot.slane %v212_v20, %v203_v8  ;;  %v356_v38 = vrot.slane %v192_v11, %v347_v17 }
  0x1d   : > { %v236_v39 = vrot.slane %v216_v21, %v203_v8  ;;  %v316_v40 = vrot.slane %v296_v22, %v295_v12  ;;  %v320_v41 = vrot.slane %v300_v23, %v295_v12  ;;  %v324_v42 = vrot.slane %v304_v24, %v295_v12 }
  0x1e   : > { %v268_v43 = vrot.slane %v248_v25, %v247_v14  ;;  %v272_v44 = vrot.slane %v252_v26, %v247_v14  ;;  %v276_v45 = vrot.slane %v256_v27, %v247_v14  ;;  %v280_v46 = vrot.slane %v260_v28, %v247_v14  ;;  %v385_v28 = vld [vmem:[%s601_s2] sm:$0xff] }
  0x1f   : > { %v328_v47 = vrot.slane %v308_v29, %v295_v12  ;;  %v364_v48 = vrot.slane %v344_v30, %v343_v16  ;;  %v368_v49 = vrot.slane %v348_v31, %v343_v16  ;;  %v372_v50 = vrot.slane %v352_v32, %v343_v16  ;;  %v394_v30 = vld [vmem:[%s602_s3] sm:$0xff] }
  0x20   : > { %v376_v54 = vrot.slane %v356_v38, %v343_v16 }
  0x8e   : > { %v197_v33 = vpop.permute.xlu0 %196  ;;  %v291_v37 = vpop.permute.xlu1 %290 }
  0x8f   : > { %v237_v51 = vmul.f32 %v224_v34, %v197_v33  ;;  %v238_v52 = vmul.f32 %v228_v35, %v197_v33  ;;  %v239_v53 = vmul.f32 %v232_v36, %v197_v33  ;;  %v240_v55 = vmul.f32 %v236_v39, %v197_v33 }
  0x90   : > { %v329_v56 = vmul.f32 %v316_v40, %v291_v37  ;;  %v330_v57 = vmul.f32 %v320_v41, %v291_v37  ;;  %v331_v58 = vmul.f32 %v324_v42, %v291_v37  ;;  %v332_v1 = vmul.f32 %v328_v47, %v291_v37 }
  0x93   : > { %v243_v59 = vpop.permute.xlu0 %242  ;;  %v339_v60 = vpop.permute.xlu1 %338 }
  0x94   : > { %v281_v61 = vmul.f32 %v268_v43, %v243_v59  ;;  %v282_v62 = vmul.f32 %v272_v44, %v243_v59  ;;  %v283_v63 = vmul.f32 %v276_v45, %v243_v59  ;;  %v284_v0 = vmul.f32 %v280_v46, %v243_v59 }
  0x95   : > { %v377_v2 = vmul.f32 %v364_v48, %v339_v60  ;;  %v378_v3 = vmul.f32 %v368_v49, %v339_v60  ;;  %v379_v4 = vmul.f32 %v372_v50, %v339_v60  ;;  %v380_v9 = vmul.f32 %v376_v54, %v339_v60 }
  0x96   : > { %v285_v5 = vadd.f32 %v281_v61, %v237_v51  ;;  %v286_v6 = vadd.f32 %v282_v62, %v238_v52  ;;  %v287_v7 = vadd.f32 %v283_v63, %v239_v53  ;;  %v288_v8 = vadd.f32 %v284_v0, %v240_v55 }
  0x98   : > { %v333_v10 = vadd.f32 %v329_v56, %v285_v5  ;;  %v334_v11 = vadd.f32 %v330_v57, %v286_v6  ;;  %v335_v12 = vadd.f32 %v331_v58, %v287_v7  ;;  %v336_v13 = vadd.f32 %v332_v1, %v288_v8 }
  0x9a   : > { %v381_v14 = vadd.f32 %v377_v2, %v333_v10  ;;  %v382_v15 = vadd.f32 %v378_v3, %v334_v11  ;;  %v383_v16 = vadd.f32 %v379_v4, %v335_v12  ;;  %v384_v17 = vadd.f32 %v380_v9, %v336_v13 }
  0x9c   : > { %v386_v18 = vadd.f32 %v382_v15, %v381_v14  ;;  %v395_v19 = vmul.f32 %v381_v14, %v381_v14  ;;  %v396_v20 = vmul.f32 %v382_v15, %v382_v15  ;;  %v397_v22 = vmul.f32 %v383_v16, %v383_v16 }
  0x9d   : > { %v398_v25 = vmul.f32 %v384_v17, %v384_v17 }
  0x9e   : > { %v387_v21 = vadd.f32 %v386_v18, %v383_v16  ;;  %v399_v23 = vadd.f32 %v396_v20, %v395_v19 }
  0xa0   : > { %v388_v24 = vadd.f32 %v387_v21, %v384_v17  ;;  %v400_v26 = vadd.f32 %v399_v23, %v397_v22 }
  0xa2   : > { %389 = vadd.xlane.f32.xlu1 %v388_v24  ;;  %v401_v27 = vadd.f32 %v400_v26, %v398_v25 }
  0xa4   : > { %402 = vadd.xlane.f32.xlu0 %v401_v27 }
 0x12b   : > { %v390_v29 = vpop.xlane.xlu1 %389 }
 0x12c   : > { %v391_v31 = vadd.f32 %v390_v29, %v385_v28 }
 0x12d   : > { %v403_v32 = vpop.xlane.xlu0 %402 }
 0x12e   : > { %393 = vst.msk [vmem:[%s601_s2] sm:$0xff] %vm392_vm1, %v391_v31  ;;  %v404_v33 = vadd.f32 %v403_v32, %v394_v30 }
 0x130   : > { %405 = vst.msk [vmem:[%s602_s3] sm:$0xff] %vm392_vm1, %v404_v33 }
 0x131 PF: > { %s14_s14 = sadd.s32 1, %s521_s14   ;;  %s603_s12 = smov %s517_s13 }
 0x132   : > { %p11_p6 = scmp.ge.s32.totalorder %s14_s14, 4   ;;  %s604_s13 = smov %s606_s15 }
 0x134   :  { %13 = sbr.rel (!%p11_p6) target bundleno = 2 (0x2), region = 66 }

</bundles_post_ra>
